<compile_context>
chip_gen: v6e
topology: v6e:2x2x1
jax: 0.10.0
libtpu: 0.0.40
codegen_flags: <defaults>
</compile_context>

<pallas_src>
import functools
import math

import jax
import jax.numpy as jnp
from jax.experimental import pallas as pl
from jax.experimental.pallas import tpu as pltpu


# ----------------------------------------------------------------------------
# Parameter / buffer setup (glue, plain JAX) -- mirrors __init__ exactly.
# ----------------------------------------------------------------------------
def make_pos_embedding(emb_size: int, maxlen: int = 201) -> jnp.ndarray:
    den = jnp.exp(
        jnp.arange(0, emb_size, 2, dtype=jnp.float32) * (-math.log(10000.0) / emb_size)
    )
    pos = jnp.arange(0, maxlen, dtype=jnp.float32).reshape(maxlen, 1)
    pe = jnp.zeros((maxlen, emb_size), dtype=jnp.float32)
    pe = pe.at[:, 0::2].set(jnp.sin(pos * den))
    pe = pe.at[:, 1::2].set(jnp.cos(pos * den))
    return pe[None, :, :]  # (1, maxlen, emb_size)


# ----------------------------------------------------------------------------
# Pallas kernels: lane-dense broadcast-add of one positional row (+ dropout).
# ----------------------------------------------------------------------------
def pe_add_kernel(x_ref, pe_ref, o_ref):
    # x_ref / o_ref: (TM, W) row tile.  pe_ref: (1, W) positional row with a
    # constant index_map -> stays VMEM-resident across grid steps.
    o_ref[...] = (x_ref[...] + pe_ref[...]).astype(o_ref.dtype)


def pe_add_dropout_kernel(x_ref, pe_ref, bits_ref, o_ref, *, p: float):
    # Inverted dropout: drop iff bits < p * 2^32 (integer-domain compare; no
    # float-convert chain, keeps the training path memory-bound on v5e VALU).
    # TODO(synk): RNG stream differs from torch.nn.Dropout; only the
    # Bernoulli(1-p) distribution and 1/(1-p) scaling match, not the bits.
    y = x_ref[...] + pe_ref[...]
    threshold = jnp.uint32(min(int(round(p * (2.0 ** 32))), 2 ** 32 - 1))
    keep = bits_ref[...] >= threshold
    scale = jnp.asarray(1.0 / (1.0 - p), dtype=y.dtype)
    o_ref[...] = jnp.where(keep, y * scale, jnp.zeros_like(y)).astype(o_ref.dtype)


# ----------------------------------------------------------------------------
# Generation-aware budgets and row-tile selection.
# ----------------------------------------------------------------------------
def _vmem_capacity_bytes() -> int:
    try:
        info = pltpu.get_tpu_info()
        for attr in ("vmem_capacity_bytes", "vmem_bytes", "vmem_size_bytes"):
            v = getattr(info, attr, None)
            if v:
                return int(v)
    except Exception:
        pass
    return 128 << 20  # conservative default (v5e/v6e-class)


def _tile_budget(n_streams: int) -> tuple[int, int]:
    """Returns (max_tile_bytes, vmem_limit_bytes) for this chip generation."""
    vmem = _vmem_capacity_bytes()
    if vmem <= (64 << 20):        # v7x-class: 64 MiB physical per TC
        vmem_limit = 48 << 20     # leave headroom for compiler scratch
    else:                         # v5e / v6e: 128 MiB physical
        vmem_limit = 64 << 20
    budget = int(vmem_limit * 0.85)
    # n_streams arrays are each double-buffered by the BlockSpec pipeline.
    max_tile_bytes = max(1 << 20, min(12 << 20, budget // (2 * n_streams)))
    return max_tile_bytes, vmem_limit


def _choose_row_tile(n_rows: int, lane_width: int, itemsize: int,
                     max_tile_bytes: int) -> int:
    """Biggest row tile: multiple of 8, byte-cap bound; prefer a divisor of
    n_rows only when it is within ~25% of the cap (one masked edge block is
    far cheaper than multiplying the grid-step overhead)."""
    if n_rows <= 8:
        return n_rows  # full-extent block (always legal)
    cap = min(n_rows, max(8, max_tile_bytes // (lane_width * itemsize)))
    cap = max(8, (cap // 8) * 8)
    tm = cap
    while tm > 8 and n_rows % tm != 0:
        tm -= 8
    if n_rows % tm == 0 and 4 * tm >= 3 * cap:
        return tm
    return cap  # partial edge block is masked by Pallas -- still correct


# ----------------------------------------------------------------------------
# Wrapper
# ----------------------------------------------------------------------------
def positional_encoding_forward(
    token_embedding: jnp.ndarray,
    pos_embedding: jnp.ndarray,
    *,
    dropout_p: float = 0.1,
    training: bool = False,
    seed: int = 0,
) -> jnp.ndarray:
    B, S, E = token_embedding.shape
    dtype = token_embedding.dtype

    if S >= pos_embedding.shape[1]:
        # PyTorch would raise IndexError here; don't let JAX silently clamp.
        raise ValueError(f"seq_len={S} must be < maxlen={pos_embedding.shape[1]}")
    if dropout_p < 0.0 or dropout_p > 1.0:
        raise ValueError(f"dropout_p={dropout_p} must be in [0, 1]")

    apply_dropout = bool(training) and dropout_p > 0.0
    if apply_dropout and dropout_p >= 1.0:
        # nn.Dropout(p=1.0) in training mode zeroes everything.
        return jnp.zeros_like(token_embedding)

    # Exactly the PyTorch indexing: pos_embedding[:, S, :] -> single row (E,)
    pe_row = pos_embedding[0, S, :].astype(dtype)

    # ---- choose a lane-dense 2D layout ------------------------------------
    total = B * S * E
    if E % 128 == 0:
        W = E
        x2d = token_embedding.reshape(B * S, E)
        pe_tile = pe_row.reshape(1, E)
    elif 128 % E == 0 and (B * S) % (128 // E) == 0:
        # Pack 128//E consecutive positions per 128-lane row; the same
        # positional row is added everywhere, so tiling it across lanes is exact.
        W = 128
        x2d = token_embedding.reshape(total // 128, 128)
        pe_tile = jnp.tile(pe_row, 128 // E).reshape(1, 128)
    else:
        Wpack = (E * 128) // math.gcd(E, 128)  # lcm(E, 128)
        if Wpack <= 4096 and total % Wpack == 0:
            # e.g. E = 96, 192, 320: keep stores unmasked full-lane vst.
            W = Wpack
            x2d = token_embedding.reshape(total // Wpack, Wpack)
            pe_tile = jnp.tile(pe_row, Wpack // E).reshape(1, Wpack)
        else:
            # TODO(synk): ragged E with too few rows to pack -> (rows, E)
            # layout; output stores are partially masked but correct.
            W = E
            x2d = token_embedding.reshape(B * S, E)
            pe_tile = pe_row.reshape(1, E)

    R = x2d.shape[0]
    itemsize = jnp.dtype(dtype).itemsize
    n_streams = 3 if apply_dropout else 2     # (x, [bits], out) are pipelined
    max_tile_bytes, vmem_limit = _tile_budget(n_streams)
    TM = _choose_row_tile(R, W, itemsize, max_tile_bytes)

    # Keep at least 2 grid steps for large activations so v7x's two
    # TensorCores both get work (skip for tiny activations where the fixed
    # per-step overhead would dominate).
    if pl.cdiv(R, TM) == 1 and R >= 16 and R * W * itemsize >= (2 << 20):
        TM = max(8, ((R + 1) // 2 + 7) // 8 * 8)

    grid = (pl.cdiv(R, TM),)
    row_spec = pl.BlockSpec((TM, W), lambda i: (i, 0))
    pe_spec = pl.BlockSpec((1, W), lambda i: (0, 0))   # VMEM-resident row
    compiler_params = pltpu.CompilerParams(
        dimension_semantics=("parallel",),             # independent row tiles
        vmem_limit_bytes=vmem_limit,
    )

    if apply_dropout:
        # Random bits generated wrapper-side (portable; lowers on any backend).
        bits2d = jax.random.bits(jax.random.PRNGKey(seed), (R, W), dtype=jnp.uint32)
        kernel = functools.partial(pe_add_dropout_kernel, p=float(dropout_p))
        out2d = pl.pallas_call(
            kernel,
            out_shape=jax.ShapeDtypeStruct((R, W), dtype),
            grid_spec=pltpu.PrefetchScalarGridSpec(
                num_scalar_prefetch=0,
                grid=grid,
                in_specs=[row_spec, pe_spec, row_spec],
                out_specs=row_spec,
            ),
            compiler_params=compiler_params,
        )(x2d, pe_tile, bits2d)
    else:
        out2d = pl.pallas_call(
            pe_add_kernel,
            out_shape=jax.ShapeDtypeStruct((R, W), dtype),
            grid_spec=pltpu.PrefetchScalarGridSpec(
                num_scalar_prefetch=0,
                grid=grid,
                in_specs=[row_spec, pe_spec],
                out_specs=row_spec,
            ),
            compiler_params=compiler_params,
        )(x2d, pe_tile)

    return out2d.reshape(B, S, E)


# ----------------------------------------------------------------------------
# Main
# ----------------------------------------------------------------------------
if __name__ == "__main__":
    B, S, E = 2, 8, 32
    key = jax.random.PRNGKey(0)
    x = jax.random.normal(key, (B, S, E), dtype=jnp.float32)

    pos_embedding = make_pos_embedding(emb_size=E, maxlen=201)

    # Eval-mode forward (dropout = identity), matching module.eval() semantics.
    out = positional_encoding_forward(
        x, pos_embedding, dropout_p=0.1, training=False, seed=0
    )
    out = jax.block_until_ready(out)

    # Reference (same semantics as the PyTorch forward): single row at index S.
    ref = x + pos_embedding[:, S, :][None]  # (1,1,E) broadcast over (B,S,E)
    assert out.shape == (B, S, E)
    assert jnp.allclose(out, ref, atol=1e-6, rtol=1e-6)

    # Training-mode forward: every element must be either 0 (dropped) or
    # ref / (1 - p) (kept, inverted-dropout scaling).
    p = 0.1
    out_tr = positional_encoding_forward(
        x, pos_embedding, dropout_p=p, training=True, seed=1234
    )
    out_tr = jax.block_until_ready(out_tr)
    scaled = ref / (1.0 - p)
    is_dropped = jnp.isclose(out_tr, 0.0, atol=1e-6)
    is_kept = jnp.isclose(out_tr, scaled, rtol=1e-5, atol=1e-5)
    assert out_tr.shape == (B, S, E)
    assert bool(jnp.all(is_dropped | is_kept))

    print("KERNEL_OK")
</pallas_src>

<mosaic_0001>
module attributes {stable_mosaic.version = 11 : i64} {
  func.func @pe_add_kernel(%arg0: i32, %arg1: memref<4x128xf32, #tpu.memory_space<vmem>>, %arg2: memref<1x128xf32, #tpu.memory_space<vmem>>, %arg3: memref<4x128xf32, #tpu.memory_space<vmem>>) attributes {dimension_semantics = [#tpu.dimension_semantics<parallel>], iteration_bounds = array<i64: 1>, scalar_prefetch = 0 : i64, scratch_operands = 0 : i64, tpu.core_type = #tpu.core_type<tc>, window_params = [{transform_indices = @transform_0, window_bounds = array<i64: 4, 128>}, {pipeline_mode = #tpu.pipeline_mode<synchronous>, transform_indices = @transform_1, window_bounds = array<i64: 1, 128>}, {transform_indices = @transform_2, window_bounds = array<i64: 4, 128>}]} {
    %c0 = arith.constant 0 : index
    %c0_0 = arith.constant 0 : index
    %0 = vector.load %arg1[%c0, %c0_0] : memref<4x128xf32, #tpu.memory_space<vmem>>, vector<4x128xf32>
    %c0_1 = arith.constant 0 : index
    %c0_2 = arith.constant 0 : index
    %1 = vector.load %arg2[%c0_1, %c0_2] : memref<1x128xf32, #tpu.memory_space<vmem>>, vector<1x128xf32>
    %2 = vector.broadcast %1 : vector<1x128xf32> to vector<4x128xf32>
    %3 = arith.addf %0, %2 : vector<4x128xf32>
    %c0_3 = arith.constant 0 : index
    %c0_4 = arith.constant 0 : index
    %4 = vector.load %arg3[%c0_3, %c0_4] : memref<4x128xf32, #tpu.memory_space<vmem>>, vector<4x128xf32>
    tpu.vector_store %arg3[%c0_3, %c0_4], %3 {strides = array<i32>} : memref<4x128xf32, #tpu.memory_space<vmem>>, vector<4x128xf32>,
    return
  }
  func.func @transform_0(%arg0: i32) -> (i32, i32) {
    %c0_i32 = arith.constant 0 : i32
    %c0_i32_0 = arith.constant 0 : i32
    return %arg0, %c0_i32 : i32, i32
  }
  func.func @transform_1(%arg0: i32) -> (i32, i32) {
    %c0_i32 = arith.constant 0 : i32
    %c0_i32_0 = arith.constant 0 : i32
    %c0_i32_1 = arith.constant 0 : i32
    return %c0_i32, %c0_i32_0 : i32, i32
  }
  func.func @transform_2(%arg0: i32) -> (i32, i32) {
    %c0_i32 = arith.constant 0 : i32
    %c0_i32_0 = arith.constant 0 : i32
    return %arg0, %c0_i32 : i32, i32
  }
}

</mosaic_0001>

<bundles_post_ra>
// kernel: tpu_custom_call.1
= control target key start
LH: loop header
LB: loop body
LE: loop exit
PB: predicated region body
PF: predicated region fallthrough
CT: control target
= control target key end

     0   :  { %7 = vsyncpa [#allocation3], 0  ;;  %s122_s0 = inlined_call_operand.hbm [shape: f32[4,128], index: 0, kind: input, shape index: {}]   ;;  %s123_s1 = inlined_call_operand.vmem [shape: f32[1,128], index: 1, kind: input, shape index: {}]   ;;  %s124_s2 = inlined_call_operand.hbm [shape: f32[4,128], index: 2, kind: output, shape index: {}]  }
   0x1   :  { %8 = vsyncpa [#allocation4], 0  ;;  %s96_s9 = smov [#allocation2]  }
   0x2   :  { %s15_s10 = sshll.u32 %s96_s9, 4  ;;  %s16_s10 = int_to_ptr.vmem [resolvable:$true] %s15_s10 }
   0x3   :  { %s60_s11 = scalar_lea.vmem %s16_s10, 64  ;;  %p65_p1 = scmp.lt.s32.totalorder %s16_s10, %s16_s10 }
   0x4   :  { %p61_p0 = scmp.ne.s32.totalorder %s16_s10, %s60_s11  ;;  %p66_p2 = scmp.lt.s32.totalorder %s60_s11, %s60_s11 }
   0x6   :  { %p67_p3 = por %p66_p2, %p65_p1 }
   0x8   :  { %p68_p4 = pnand %p67_p3, %p61_p0 }
   0xa   :  { %71 = shalt.err (!%p68_p4)
}
   0xb   :  { %18 = dma.hbm_to_vmem [thread:$0]  %s122_s0, 64, %s16_s10, [#allocation3]  }
   0xc   :  { %92 = dma.done.wait [#allocation3], 64  }
   0xd   :  { %93 = vsyncadd [#allocation3], 4294967232  ;;  %s97_s14 = smov [#allocation5]   ;;  %v24_v0 = vld [vmem:[#allocation2] sm:$0xf] }
   0xe   :  { %s40_s15 = sshll.u32 %s97_s14, 4  ;;  %v49_v1 = vld [vmem:[%s123_s1] ss:$0 sm:$0xff]  ;;  %s41_s15 = int_to_ptr.vmem [resolvable:$true] %s40_s15 }
   0xf   :  { %v32_v2 = vadd.f32 %v49_v1, %v24_v0  ;;  %s72_s18 = scalar_lea.vmem %s41_s15, 64  ;;  %p77_p6 = scmp.lt.s32.totalorder %s41_s15, %s41_s15 }
  0x10   :  { %p73_p5 = scmp.ne.s32.totalorder %s41_s15, %s72_s18  ;;  %p78_p7 = scmp.lt.s32.totalorder %s72_s18, %s72_s18 }
  0x11   :  { %33 = vst [vmem:[#allocation5] sm:$0xf] %v32_v2 }
  0x12   :  { %p79_p8 = por %p78_p7, %p77_p6 }
  0x14   :  { %p80_p9 = pnand %p79_p8, %p73_p5 }
  0x16   :  { %83 = shalt.err (!%p80_p9)
}
  0x17   :  { %43 = dma.vmem_to_hbm [thread:$0]  %s41_s15, 64, %s124_s2, [#allocation4]  }
  0x18   :  { %94 = dma.done.wait [#allocation4], 64  }
  0x19   :  { %95 = vsyncadd [#allocation4], 4294967232 }
  0x1a   :  { %47 = vsyncpa [#allocation3], 1 }
  0x1b   :  { %48 = vsyncpa [#allocation4], 1 }

</bundles_post_ra>
